<compile_context>
chip_gen: v7x
topology: tpu7x:2x2x1
jax: 0.10.0
libtpu: 0.0.40
codegen_flags: <defaults>
</compile_context>

<pallas_src>
import functools

import jax
import jax.numpy as jnp
from jax.experimental import pallas as pl
from jax.experimental.pallas import tpu as pltpu


def ffn_kernel(x_ref, w1_ref, b1_ref, w2_ref, b2_ref, o_ref, *, ipb, c):
    # x_ref/o_ref: (ipb*C, T) pixel tile (channels on sublanes, pixels on lanes)
    # w1_ref: (Ch, C), b1_ref: (Ch, 1), w2_ref: (C, Ch), b2_ref: (C, 1)
    # (eval-mode BatchNorm already folded into weights/biases).
    w1 = w1_ref[...]
    b1 = b1_ref[...]
    w2 = w2_ref[...]
    b2 = b2_ref[...]
    for i in range(ipb):                        # small static unrolled loop
        lo, hi = i * c, (i + 1) * c
        xm = x_ref[lo:hi, :].astype(w1.dtype)   # matmul dtype (bf16/f32)
        # Conv1x1 + BN1 (folded) + ReLU, f32 accumulate
        h = jnp.dot(w1, xm, preferred_element_type=jnp.float32)
        h = jnp.maximum(h + b1, 0.0)
        # Conv1x1 + BN2 (folded)
        y = jnp.dot(w2, h.astype(w2.dtype), preferred_element_type=jnp.float32)
        y = y + b2
        # drop_path = Identity; residual re-reads x (short live range), f32 add
        o_ref[lo:hi, :] = (y + x_ref[lo:hi, :].astype(jnp.float32)).astype(o_ref.dtype)


def _default_budgets():
    """(max_tile_pix, vmem_limit_bytes) tuned per TPU generation."""
    vmem_cap = 128 * 1024 * 1024
    try:
        vmem_cap = pltpu.get_tpu_info().vmem_capacity_bytes
    except Exception:
        pass
    if vmem_cap >= 100 * 1024 * 1024:            # v5e / v6e: 128 MiB VMEM
        return 2048, 64 * 1024 * 1024
    return 1024, 40 * 1024 * 1024                # v7x: 64 MiB VMEM


def _pick_lane_tile(hw, max_tile_pix):
    """Lane tile for the H*W axis: a multiple of 128 <= hw whenever possible."""
    if hw < 128:
        return hw                                # full-extent block (tiny image)
    hi = min(max(128, (max_tile_pix // 128) * 128), (hw // 128) * 128)
    steps = pl.cdiv(hw, hi)                      # fewest grid steps achievable
    tile = ((pl.cdiv(hw, steps) + 127) // 128) * 128   # least waste at that count
    return min(tile, hi)


def ffn_forward(x_nchw, params, *, matmul_dtype=jnp.bfloat16,
                max_tile_pix=None, vmem_limit_bytes=None,
                target_bytes_per_step=512 * 1024,
                single_buffer_weights=False):
    """x_nchw: (N, C, H, W). Returns (N, C, H, W) in the same dtype."""
    N, C, H, W = x_nchw.shape
    Ch = params["w1"].shape[0]
    assert params["w1"].shape == (Ch, C)
    assert params["w2"].shape == (C, Ch), "residual requires out_features == in_features"
    assert C % 8 == 0 and Ch % 8 == 0, "channel counts must be multiples of 8"

    d_tile, d_vmem = _default_budgets()
    if max_tile_pix is None:
        max_tile_pix = d_tile
    if vmem_limit_bytes is None:
        vmem_limit_bytes = d_vmem

    # Fold eval-mode BatchNorm into the conv weights/biases (exact).
    s1, t1 = params["s1"], params["t1"]
    s2, t2 = params["s2"], params["t2"]
    w1f = (params["w1"] * s1[:, None]).astype(matmul_dtype)        # (Ch, C)
    b1f = (params["b1"] * s1 + t1).astype(jnp.float32)[:, None]    # (Ch, 1)
    w2f = (params["w2"] * s2[:, None]).astype(matmul_dtype)        # (C, Ch)
    b2f = (params["b2"] * s2 + t2).astype(jnp.float32)[:, None]    # (C, 1)

    HW = H * W
    io_bytes = jnp.dtype(x_nchw.dtype).itemsize
    w_bytes = jnp.dtype(matmul_dtype).itemsize

    tile = _pick_lane_tile(HW, max_tile_pix)
    n_pix = pl.cdiv(HW, tile)

    # Images per grid step: big enough to amortize the ~0.35us step overhead.
    divisors = [k for k in range(1, N + 1) if N % k == 0]
    per_img = 2 * C * tile * io_bytes                     # read x + write out
    want = max(1, -(-target_bytes_per_step // per_img))
    ipb = next((k for k in divisors if k >= want), N)

    # VMEM fit: double-buffered I/O + weight buffers + in-flight f32 intermediates.
    wbuf_mult = 1 if single_buffer_weights else 2

    def vmem_estimate(t, k):
        io = 2 * k * C * t * 2 * io_bytes
        wts = wbuf_mult * 2 * Ch * C * w_bytes
        live = (Ch + 2 * C) * t * 4
        return io + wts + live

    budget = int(0.9 * vmem_limit_bytes)
    while ipb > 1 and vmem_estimate(tile, ipb) > budget:
        ipb = max(k for k in divisors if k < ipb)
    while tile > 128 and vmem_estimate(tile, ipb) > budget:
        tile = max(128, ((tile - 128) // 128) * 128)
        n_pix = pl.cdiv(HW, tile)

    # Keep at least 2 grid steps when there is enough work (megacore balance, v7x).
    if n_pix * (N // ipb) < 2 and N >= 2:
        smaller = [k for k in divisors if k <= N // 2]
        if smaller:
            ipb = smaller[-1]

    grid = (N // ipb, n_pix)
    x2d = x_nchw.reshape(N * C, HW)                       # free reshape (NCHW)

    xio_spec = pl.BlockSpec((ipb * C, tile), lambda n, p: (n, p))
    if single_buffer_weights:
        # Constant-index operands: a single resident buffer (saves VMEM on v7x).
        w1_spec = pl.BlockSpec((Ch, C), lambda n, p: (0, 0), pipeline_mode=pl.Buffered(1))
        b1_spec = pl.BlockSpec((Ch, 1), lambda n, p: (0, 0), pipeline_mode=pl.Buffered(1))
        w2_spec = pl.BlockSpec((C, Ch), lambda n, p: (0, 0), pipeline_mode=pl.Buffered(1))
        b2_spec = pl.BlockSpec((C, 1), lambda n, p: (0, 0), pipeline_mode=pl.Buffered(1))
    else:
        w1_spec = pl.BlockSpec((Ch, C), lambda n, p: (0, 0))
        b1_spec = pl.BlockSpec((Ch, 1), lambda n, p: (0, 0))
        w2_spec = pl.BlockSpec((C, Ch), lambda n, p: (0, 0))
        b2_spec = pl.BlockSpec((C, 1), lambda n, p: (0, 0))

    kernel = functools.partial(ffn_kernel, ipb=ipb, c=C)

    out2d = pl.pallas_call(
        kernel,
        out_shape=jax.ShapeDtypeStruct((N * C, HW), x_nchw.dtype),
        grid_spec=pltpu.PrefetchScalarGridSpec(
            num_scalar_prefetch=0,
            grid=grid,
            in_specs=[xio_spec, w1_spec, b1_spec, w2_spec, b2_spec],
            out_specs=xio_spec,
        ),
        compiler_params=pltpu.CompilerParams(
            dimension_semantics=("parallel", "parallel"),
            vmem_limit_bytes=int(vmem_limit_bytes),
        ),
    )(x2d, w1f, b1f, w2f, b2f)

    return out2d.reshape(N, C, H, W)


def make_params(key, in_features, out_features, hidden_features=None, eps=1e-5):
    """Synthetic params matching the PyTorch module (eval-mode BN as s/t).

    Conv2d weights kept in PyTorch (Cout, Cin) orientation (1x1 squeezed).
    The module uses hidden == in_features; rectangular hidden is also supported.
    """
    ks = jax.random.split(key, 10)
    Ci, Co = in_features, out_features
    Ch = in_features if hidden_features is None else hidden_features

    w1 = jax.random.normal(ks[0], (Ch, Ci), jnp.float32) * 0.1   # (Cout, Cin)
    b1 = jax.random.normal(ks[1], (Ch,), jnp.float32) * 0.1
    g1 = 1.0 + 0.1 * jax.random.normal(ks[2], (Ch,), jnp.float32)
    be1 = 0.1 * jax.random.normal(ks[3], (Ch,), jnp.float32)
    m1 = 0.05 * jax.random.normal(ks[4], (Ch,), jnp.float32)
    v1 = 1.0 + 0.1 * jnp.abs(jax.random.normal(ks[5], (Ch,), jnp.float32))

    w2 = jax.random.normal(ks[6], (Co, Ch), jnp.float32) * 0.1   # (Cout, Cin)
    b2 = jax.random.normal(ks[7], (Co,), jnp.float32) * 0.1
    g2 = 1.0 + 0.1 * jax.random.normal(ks[8], (Co,), jnp.float32)
    be2 = 0.1 * jax.random.normal(ks[9], (Co,), jnp.float32)
    m2 = jnp.zeros((Co,), jnp.float32)
    v2 = jnp.ones((Co,), jnp.float32)

    s1 = g1 / jnp.sqrt(v1 + eps)
    t1 = be1 - m1 * s1
    s2 = g2 / jnp.sqrt(v2 + eps)
    t2 = be2 - m2 * s2
    return dict(w1=w1, b1=b1, s1=s1, t1=t1, w2=w2, b2=b2, s2=s2, t2=t2)


def ffn_reference(x_nchw, p):
    """Pure-JAX f32 reference of the same forward pass."""
    N, C, H, W = x_nchw.shape
    x = x_nchw.astype(jnp.float32).reshape(N, C, H * W)
    h = jnp.einsum("oc,ncp->nop", p["w1"], x) + p["b1"][:, None]
    h = h * p["s1"][:, None] + p["t1"][:, None]
    h = jnp.maximum(h, 0.0)
    y = jnp.einsum("oc,ncp->nop", p["w2"], h) + p["b2"][:, None]
    y = y * p["s2"][:, None] + p["t2"][:, None]
    return (y + x).reshape(N, C, H, W).astype(x_nchw.dtype)


if __name__ == "__main__":
    key = jax.random.PRNGKey(0)
    k1, k2, k3, kp, kp2 = jax.random.split(key, 5)

    # Primary shape: batch=2, channels=16 (in_features == out_features), 16x16.
    N, C, H, W = 2, 16, 16, 16
    x = jax.random.normal(k1, (N, C, H, W), jnp.float32)
    params = make_params(kp, C, C)
    ref = ffn_reference(x, params)

    # 1) Exact f32 MXU path (single 256-lane dense tile per image).
    out_f32 = jax.block_until_ready(ffn_forward(x, params, matmul_dtype=jnp.float32))
    assert out_f32.shape == (N, C, H, W) and out_f32.dtype == x.dtype
    assert jnp.allclose(out_f32, ref, atol=1e-4, rtol=1e-4)

    # 2) Default bf16-MXU path with f32 activation I/O.
    out_bf = jax.block_until_ready(ffn_forward(x, params))
    assert jnp.allclose(out_bf, ref, atol=5e-2, rtol=5e-2)

    # 3) bf16 activation I/O (halves HBM traffic; f32 accumulate/residual inside).
    xb = x.astype(jnp.bfloat16)
    ref_b = ffn_reference(xb, params).astype(jnp.float32)
    out_b = jax.block_until_ready(ffn_forward(xb, params))
    assert out_b.dtype == jnp.bfloat16
    assert jnp.allclose(out_b.astype(jnp.float32), ref_b, atol=5e-2, rtol=5e-2)

    # 4) Ragged pixel axis (14x14 = 196): dense 128-lane tile + clipped last tile,
    #    4 images batched into one grid step.
    x4 = jax.random.normal(k2, (4, C, 14, 14), jnp.float32)
    ref4 = ffn_reference(x4, params)
    out4 = jax.block_until_ready(
        ffn_forward(x4, params, matmul_dtype=jnp.float32, max_tile_pix=128))
    assert jnp.allclose(out4, ref4, atol=1e-4, rtol=1e-4)

    # 5) Rectangular hidden layer (hidden=32 != C) + tiny image (H*W=64 < 128).
    params_h = make_params(kp2, C, C, hidden_features=32)
    x5 = jax.random.normal(k3, (4, C, 8, 8), jnp.float32)
    ref5 = ffn_reference(x5, params_h)
    out5 = jax.block_until_ready(ffn_forward(x5, params_h, matmul_dtype=jnp.float32))
    assert jnp.allclose(out5, ref5, atol=1e-4, rtol=1e-4)

    print("KERNEL_OK")
</pallas_src>

<mosaic_0001>
module attributes {stable_mosaic.version = 11 : i64} {
  func.func @ffn_kernel(%arg0: i32, %arg1: i32, %arg2: memref<16x256xf32, #tpu.memory_space<vmem>>, %arg3: memref<16x16xf32, #tpu.memory_space<vmem>>, %arg4: memref<16x1xf32, #tpu.memory_space<vmem>>, %arg5: memref<16x16xf32, #tpu.memory_space<vmem>>, %arg6: memref<16x1xf32, #tpu.memory_space<vmem>>, %arg7: memref<16x256xf32, #tpu.memory_space<vmem>>) attributes {dimension_semantics = [#tpu.dimension_semantics<parallel>, #tpu.dimension_semantics<parallel>], iteration_bounds = array<i64: 2, 1>, scalar_prefetch = 0 : i64, scratch_operands = 0 : i64, tpu.core_type = #tpu.core_type<tc>, window_params = [{transform_indices = @transform_0, window_bounds = array<i64: 16, 256>}, {pipeline_mode = #tpu.pipeline_mode<synchronous>, transform_indices = @transform_1, window_bounds = array<i64: 16, 16>}, {pipeline_mode = #tpu.pipeline_mode<synchronous>, transform_indices = @transform_2, window_bounds = array<i64: 16, 1>}, {pipeline_mode = #tpu.pipeline_mode<synchronous>, transform_indices = @transform_3, window_bounds = array<i64: 16, 16>}, {pipeline_mode = #tpu.pipeline_mode<synchronous>, transform_indices = @transform_4, window_bounds = array<i64: 16, 1>}, {transform_indices = @transform_5, window_bounds = array<i64: 16, 256>}]} {
    %c0 = arith.constant 0 : index
    %c0_0 = arith.constant 0 : index
    %0 = vector.load %arg3[%c0, %c0_0] : memref<16x16xf32, #tpu.memory_space<vmem>>, vector<16x16xf32>
    %c0_1 = arith.constant 0 : index
    %c0_2 = arith.constant 0 : index
    %1 = vector.load %arg4[%c0_1, %c0_2] : memref<16x1xf32, #tpu.memory_space<vmem>>, vector<16x1xf32>
    %c0_3 = arith.constant 0 : index
    %c0_4 = arith.constant 0 : index
    %2 = vector.load %arg5[%c0_3, %c0_4] : memref<16x16xf32, #tpu.memory_space<vmem>>, vector<16x16xf32>
    %c0_5 = arith.constant 0 : index
    %c0_6 = arith.constant 0 : index
    %3 = vector.load %arg6[%c0_5, %c0_6] : memref<16x1xf32, #tpu.memory_space<vmem>>, vector<16x1xf32>
    %c0_7 = arith.constant 0 : index
    %c0_8 = arith.constant 0 : index
    %4 = vector.load %arg2[%c0_7, %c0_8] : memref<16x256xf32, #tpu.memory_space<vmem>>, vector<16x256xf32>
    %cst = arith.constant dense<0.000000e+00> : vector<16x256xf32>
    %5 = tpu.matmul %0, %4, %cst {dimension_numbers = #tpu.dot_dimension_numbers<[1], [0], [0], [1], [0, 0, 1, 1], [], []>} : vector<16x16xf32>, vector<16x256xf32>, vector<16x256xf32> -> vector<16x256xf32>
    %6 = vector.broadcast %1 : vector<16x1xf32> to vector<16x256xf32>
    %7 = arith.addf %5, %6 : vector<16x256xf32>
    %cst_9 = arith.constant 0.000000e+00 : f32
    %8 = vector.broadcast %cst_9 : f32 to vector<16x256xf32>
    %9 = arith.maximumf %7, %8 : vector<16x256xf32>
    %cst_10 = arith.constant dense<0.000000e+00> : vector<16x256xf32>
    %10 = tpu.matmul %2, %9, %cst_10 {dimension_numbers = #tpu.dot_dimension_numbers<[1], [0], [0], [1], [0, 0, 1, 1], [], []>} : vector<16x16xf32>, vector<16x256xf32>, vector<16x256xf32> -> vector<16x256xf32>
    %11 = vector.broadcast %3 : vector<16x1xf32> to vector<16x256xf32>
    %12 = arith.addf %10, %11 : vector<16x256xf32>
    %c0_11 = arith.constant 0 : index
    %c0_12 = arith.constant 0 : index
    %13 = vector.load %arg2[%c0_11, %c0_12] : memref<16x256xf32, #tpu.memory_space<vmem>>, vector<16x256xf32>
    %14 = arith.addf %12, %13 : vector<16x256xf32>
    %c0_13 = arith.constant 0 : index
    %c0_14 = arith.constant 0 : index
    %15 = vector.load %arg7[%c0_13, %c0_14] : memref<16x256xf32, #tpu.memory_space<vmem>>, vector<16x256xf32>
    tpu.vector_store %arg7[%c0_13, %c0_14], %14 {strides = array<i32>} : memref<16x256xf32, #tpu.memory_space<vmem>>, vector<16x256xf32>,
    return
  }
  func.func @transform_0(%arg0: i32, %arg1: i32) -> (i32, i32) {
    %c0_i32 = arith.constant 0 : i32
    return %arg0, %arg1 : i32, i32
  }
  func.func @transform_1(%arg0: i32, %arg1: i32) -> (i32, i32) {
    %c0_i32 = arith.constant 0 : i32
    %c0_i32_0 = arith.constant 0 : i32
    %c0_i32_1 = arith.constant 0 : i32
    return %c0_i32, %c0_i32_0 : i32, i32
  }
  func.func @transform_2(%arg0: i32, %arg1: i32) -> (i32, i32) {
    %c0_i32 = arith.constant 0 : i32
    %c0_i32_0 = arith.constant 0 : i32
    %c0_i32_1 = arith.constant 0 : i32
    return %c0_i32, %c0_i32_0 : i32, i32
  }
  func.func @transform_3(%arg0: i32, %arg1: i32) -> (i32, i32) {
    %c0_i32 = arith.constant 0 : i32
    %c0_i32_0 = arith.constant 0 : i32
    %c0_i32_1 = arith.constant 0 : i32
    return %c0_i32, %c0_i32_0 : i32, i32
  }
  func.func @transform_4(%arg0: i32, %arg1: i32) -> (i32, i32) {
    %c0_i32 = arith.constant 0 : i32
    %c0_i32_0 = arith.constant 0 : i32
    %c0_i32_1 = arith.constant 0 : i32
    return %c0_i32, %c0_i32_0 : i32, i32
  }
  func.func @transform_5(%arg0: i32, %arg1: i32) -> (i32, i32) {
    %c0_i32 = arith.constant 0 : i32
    return %arg0, %arg1 : i32, i32
  }
}

</mosaic_0001>

<bundles_post_ra>
// kernel: tpu_custom_call.1
= control target key start
LH: loop header
LB: loop body
LE: loop exit
PB: predicated region body
PF: predicated region fallthrough
CT: control target
= control target key end

     0   :  { %10 = vsyncpa [#allocation3], 0  ;;  %s1431_s0 = inlined_call_operand.hbm [shape: f32[32,256], index: 0, kind: input, shape index: {}]   ;;  %s1432_s1 = inlined_call_operand.hbm [shape: f32[16,16], index: 1, kind: input, shape index: {}]   ;;  %s1433_s2 = inlined_call_operand.hbm [shape: f32[16,1], index: 2, kind: input, shape index: {}]   ;;  %s1434_s3 = inlined_call_operand.hbm [shape: f32[16,16], index: 3, kind: input, shape index: {}]   ;;  %s1435_s4 = inlined_call_operand.hbm [shape: f32[16,1], index: 4, kind: input, shape index: {}]   ;;  %s1436_s5 = inlined_call_operand.hbm [shape: f32[32,256], index: 5, kind: output, shape index: {}]  }
   0x1   :  { %12 = vsyncpa [#allocation3 + $0x1], 0 }
   0x2   :  { %13 = vsyncpa [#allocation6], 0 }
   0x3   :  { %14 = vsyncpa [#allocation9], 0 }
   0x4   :  { %15 = vsyncpa [#allocation4], 0 }
   0x5   :  { %17 = vsyncpa [#allocation4 + $0x1], 0  ;;  %s1109_s18 = smov 0   ;;  %s1111_s19 = smov 0  }
   0x6   :  { %s1113_s20 = smov 0   ;;  %s1115_s21 = smov 0  }
   0x7   :  { %s1117_s22 = smov 0   ;;  %s1119_s23 = smov 0  }
   0x8 LB: > { %1443 = sst [smem:[#allocation16_spill]] %s1043_s18  ;;  %s677_s24 = sadd.s32 4294967295, %s1063_s23   ;;  %s1063_s23 = sphi %s1119_s23, %s23_s23   ;;  %s1059_s22 = sphi %s1117_s22, %s1466_s22   ;;  %s1055_s21 = sphi %s1115_s21, %s1465_s21   ;;  %s1051_s20 = sphi %s1113_s20, %s1464_s20   ;;  %s1047_s19 = sphi %s1111_s19, %s1463_s19   ;;  %s1043_s18 = sphi %s1109_s18, %s1462_s18  }
   0x9   : > { %s678_s25 = sadd.s32 4294967294, %s1063_s23   ;;  %p57_p0 = scmp.ne.s32.totalorder %s1047_s19, %s1043_s18 }
   0xa   : > { %p1143_p1 = scmp.eq.s32.totalorder %s677_s24, 0  ;;  %p1147_p2 = scmp.eq.s32.totalorder %s677_s24, 1 }
   0xb   : > { %p173_p3 = scmp.eq.s32.totalorder %s678_s25, 1  ;;  %p679_p5 = scmp.ge.s32.totalorder %s1063_s23, 1 }
   0xc   : > { %s1444_s26 = scalar_select %p1143_p1, 1, 0 }
   0xd   : > { %s1445_s27 = scalar_select %p1147_p2, 1, 0 }
   0xe   : > { %p1153_p4 = por %p1143_p1, %p57_p0  ;;  %p1158_p6 = por %p173_p3, %p57_p0 }
   0xf   : > { %p180_p7 = scmp.lt.s32.totalorder %s1063_s23, 3  ;;  %s1065_s6 = smov [#allocation5]  }
  0x10   : > { %s1446_s28 = scalar_select %p1153_p4, 1, 0 }
  0x11   : > { %s1447_s29 = scalar_select %p1158_p6, 1, 0 }
  0x12   : > { %p1163_p8 = pnand %p679_p5, %p180_p7  ;;  %s192_s7 = sshll.u32 %s1065_s6, 4  ;;  %s1167_s7 = int_to_ptr.vmem [resolvable:$true] %s192_s7 }
  0x13   : > { %1448 = sst [smem:[#allocation17_spill]] %s1447_s29  ;;  %s1066_s9 = smov [#allocation8]  }
  0x14   : > { %s1449_s30 = scalar_select %p1163_p8, 1, 0 }
  0x15   : > { %p738_p9 = pneg %p1163_p8  ;;  %s218_s10 = sshll.u32 %s1066_s9, 4  ;;  %s1178_s10 = int_to_ptr.vmem [resolvable:$true] %s218_s10 }
  0x16   : > { %s1067_s11 = smov [#allocation7]   ;;  %s831_s15 = scalar_lea.hbm %s1432_s1, 256 }
  0x17   : > { %p1174_p11 = pnand %p738_p9, %p1143_p1  ;;  %s1180_s12 = sshll.u32 %s1067_s11, 4  ;;  %s206_s12 = int_to_ptr.vmem [resolvable:$true] %s1180_s12 }
  0x18   : > { %p832_p12 = scmp.ne.s32.totalorder %s1432_s1, %s831_s15  ;;  %p838_p5 = scmp.lt.u32.totalorder %s831_s15, %s1432_s1 }
  0x19   : > { %p1190_p13 = pneg %p1174_p11 }
  0x1b   : > { %p834_p0 = pnand %p1190_p13, %p832_p12 }
  0x1d   : > { %p835_p3 = pneg %p834_p0 }
  0x1f   : > { %p840_p7 = pnand %p838_p5, %p835_p3 }
  0x21   : > { %843 = shalt.err (!%p840_p7)
}
  0x22   : > { %s844_s9 = scalar_lea.vmem %s1167_s7, 256  ;;  %p852_p1 = scmp.lt.s32.totalorder %s1167_s7, %s1167_s7 }
  0x23   : > { %p845_p9 = scmp.ne.s32.totalorder %s1167_s7, %s844_s9  ;;  %p853_p4 = scmp.lt.s32.totalorder %s844_s9, %s844_s9 }
  0x25   : > { %p847_p10 = pnand %p845_p9, %p1190_p13  ;;  %p854_p12 = por %p853_p4, %p852_p1 }
  0x27   : > { %p848_p6 = pneg %p847_p10 }
  0x29   : > { %p855_p0 = pnand %p854_p12, %p848_p6 }
  0x2b   : > { %858 = shalt.err (!%p855_p0)
}
  0x2c   : > { %s1068_s11 = smov 128   ;;  %s1069_s13 = smov 8  }
  0x2d   : > { %741 = dma.hbm_to_vmem [thread:$0]  (!%p1174_p11), %s1432_s1, 256, %s1167_s7, [#allocation6], %s1068_s11, %s1068_s11, %s1069_s13  }
  0x2e   : > { %s859_s25 = scalar_lea.hbm %s1434_s3, 256 }
  0x2f   : > { %p860_p1 = scmp.ne.s32.totalorder %s1434_s3, %s859_s25  ;;  %p866_p10 = scmp.lt.u32.totalorder %s859_s25, %s1434_s3 }
  0x31   : > { %p862_p4 = pnand %p860_p1, %p1190_p13 }
  0x33   : > { %p863_p6 = pneg %p862_p4 }
  0x35   : > { %p868_p3 = pnand %p866_p10, %p863_p6 }
  0x37   : > { %871 = shalt.err (!%p868_p3)
}
  0x38   : > { %s872_s7 = scalar_lea.vmem %s1178_s10, 256  ;;  %p880_p12 = scmp.lt.s32.totalorder %s1178_s10, %s1178_s10 }
  0x39   : > { %p873_p5 = scmp.ne.s32.totalorder %s1178_s10, %s872_s7  ;;  %p881_p0 = scmp.lt.s32.totalorder %s872_s7, %s872_s7 }
  0x3b   : > { %p875_p7 = pnand %p873_p5, %p1190_p13  ;;  %p882_p1 = por %p881_p0, %p880_p12 }
  0x3d   : > { %p876_p9 = pneg %p875_p7 }
  0x3f   : > { %p883_p4 = pnand %p882_p1, %p876_p9 }
  0x41   : > { %886 = shalt.err (!%p883_p4)
}
  0x42   : > { %747 = dma.hbm_to_vmem [thread:$0]  (!%p1174_p11), %s1434_s3, 256, %s1178_s10, [#allocation9], %s1068_s11, %s1068_s11, %s1069_s13  }
  0x43   : > { %s887_s16 = scalar_lea.hbm %s1433_s2, 256 }
  0x44   : > { %p888_p6 = scmp.ne.s32.totalorder %s1433_s2, %s887_s16  ;;  %p894_p5 = scmp.lt.u32.totalorder %s887_s16, %s1433_s2 }
  0x46   : > { %p890_p10 = pnand %p888_p6, %p1190_p13 }
  0x48   : > { %p891_p3 = pneg %p890_p10 }
  0x4a   : > { %p896_p7 = pnand %p894_p5, %p891_p3 }
  0x4c   : > { %899 = shalt.err (!%p896_p7)
}
  0x4d   : > { %s900_s7 = scalar_lea.vmem %s206_s12, 256  ;;  %p908_p1 = scmp.lt.s32.totalorder %s206_s12, %s206_s12 }
  0x4e   : > { %p901_p9 = scmp.ne.s32.totalorder %s206_s12, %s900_s7  ;;  %p909_p4 = scmp.lt.s32.totalorder %s900_s7, %s900_s7 }
  0x50   : > { %p903_p12 = pnand %p901_p9, %p1190_p13  ;;  %p910_p8 = por %p909_p4, %p908_p1 }
  0x52   : > { %p904_p0 = pneg %p903_p12 }
  0x54   : > { %p911_p2 = pnand %p910_p8, %p904_p0 }
  0x56   : > { %914 = shalt.err (!%p911_p2)
}
  0x57   : > { %744 = dma.hbm_to_vmem [thread:$0]  (!%p1174_p11), %s1433_s2, 256, %s206_s12, [#allocation6], %s1068_s11, %s1068_s11, %s1069_s13  }
  0x58   : > { %s1070_s29 = smov [#allocation10]   ;;  %s915_s17 = scalar_lea.hbm %s1435_s4, 256 }
  0x59   : > { %s231_s14 = sshll.u32 %s1070_s29, 4  ;;  %p916_p2 = scmp.ne.s32.totalorder %s1435_s4, %s915_s17  ;;  %s232_s14 = int_to_ptr.vmem [resolvable:$true] %s231_s14 }
  0x5a   : > { %p922_p10 = scmp.lt.u32.totalorder %s915_s17, %s1435_s4 }
  0x5b   : > { %p918_p8 = pnand %p916_p2, %p1190_p13 }
  0x5d   : > { %p919_p6 = pneg %p918_p8 }
  0x5f   : > { %p924_p3 = pnand %p922_p10, %p919_p6 }
  0x61   : > { %927 = shalt.err (!%p924_p3)
}
  0x62   : > { %s928_s12 = scalar_lea.vmem %s232_s14, 256  ;;  %p936_p12 = scmp.lt.s32.totalorder %s232_s14, %s232_s14 }
  0x63   : > { %p929_p5 = scmp.ne.s32.totalorder %s232_s14, %s928_s12  ;;  %p937_p0 = scmp.lt.s32.totalorder %s928_s12, %s928_s12 }
  0x65   : > { %p931_p7 = pnand %p929_p5, %p1190_p13  ;;  %p938_p1 = por %p937_p0, %p936_p12 }
  0x67   : > { %p932_p9 = pneg %p931_p7 }
  0x69   : > { %p939_p4 = pnand %p938_p1, %p932_p9 }
  0x6b   : > { %942 = shalt.err (!%p939_p4)
}
  0x6c   : > { %750 = dma.hbm_to_vmem [thread:$0]  (!%p1174_p11), %s1435_s4, 256, %s232_s14, [#allocation9], %s1068_s11, %s1068_s11, %s1069_s13  }
  0x6d   : > { %s35_s24 = sadd.s32 1, %s1059_s22  ;;  %s44_s8 = sadd.s32 1, %s1051_s20 }
  0x6e   : > { %p37_p13 = scmp.ge.s32.totalorder %s35_s24, 2  ;;  %p51_p2 = scmp.ne.s32.totalorder %s1051_s20, %s1047_s19 }
  0x6f   : > { %p52_p8 = scmp.eq.s32.totalorder %s1063_s23, 0  ;;  %p763_p6 = scmp.lt.s32.totalorder %s1063_s23, 2 }
  0x70   : > { %s1468_s24 = smov (%p37_p13, %s35_s24), 0  ;;  %p1452_p3 = scmp.ne.s32.totalorder %s1445_s27, 0 }
  0x71   : > { %p53_p10 = por %p52_p8, %p51_p2  ;;  %s39_s15 = ssub.s32 %s1059_s22, %s1468_s24 }
  0x72   : > { %p1293_p5 = por %p1452_p3, %p51_p2  ;;  %s245_s16 = sand.u32 1, %s1051_s20  }
  0x73   : > { %p42_p7 = scmp.eq.s32.totalorder %s39_s15, 0  ;;  %s685_s11 = sshll.u32 %s245_s16, 5 }
  0x74   : > { %s707_s13 = sshll.u32 %s1059_s22, 9  ;;  %s249_s27 = scalar_lea.vmem [#allocation2], %s685_s11 }
  0x75   : > { %s1302_s14 = scalar_select %p42_p7, %s1051_s20, %s44_s8  }
  0x76   : > { %s1307_s6 = scalar_lea.hbm %s1431_s0, %s707_s13  ;;  %s259_s9 = sshll.u32 %s249_s27, 4  ;;  %s1315_s9 = int_to_ptr.vmem [resolvable:$true] %s259_s9 }
  0x77   : > { %p1311_p11 = pnand %p763_p6, %p53_p10  ;;  %s1317_s12 = scalar_lea.sflag [#allocation3], %s245_s16 }
  0x78   : > { %s943_s10 = scalar_lea.hbm %s1307_s6, 512  ;;  %s948_s15 = scalar_lea.hbm %s1431_s0, 1024 }
  0x79   : > { %p944_p9 = scmp.ne.s32.totalorder %s1307_s6, %s943_s10  ;;  %p945_p12 = pneg %p1311_p11 }
  0x7a   : > { %p949_p4 = scmp.lt.u32.totalorder %s1307_s6, %s1431_s0  ;;  %p950_p13 = scmp.lt.u32.totalorder %s948_s15, %s943_s10 }
  0x7b   : > { %p946_p0 = pnand %p945_p12, %p944_p9  ;;  %p952_p8 = scmp.lt.u32.totalorder %s943_s10, %s1307_s6 }
  0x7c   : > { %p951_p2 = por %p950_p13, %p949_p4 }
  0x7d   : > { %p947_p1 = pneg %p946_p0 }
  0x7e   : > { %p953_p6 = por %p952_p8, %p951_p2 }
  0x80   : > { %p954_p10 = pnand %p953_p6, %p947_p1 }
  0x82   : > { %957 = shalt.err (!%p954_p10)
}
  0x83   : > { %s958_s16 = scalar_lea.vmem %s1315_s9, 512  ;;  %s1071_s17 = smov [#allocation2]  }
  0x84   : > { %p959_p3 = scmp.ne.s32.totalorder %s1315_s9, %s958_s16  ;;  %s963_s25 = sshll.u32 %s1071_s17, 4  ;;  %s964_s25 = int_to_ptr.vmem [resolvable:$false] %s963_s25 }
  0x85   : > { %s965_s27 = scalar_lea.vmem %s964_s25, 1024  ;;  %p966_p0 = scmp.lt.s32.totalorder %s1315_s9, %s964_s25 }
  0x86   : > { %p961_p7 = pnand %p959_p3, %p945_p12  ;;  %p967_p4 = scmp.lt.s32.totalorder %s965_s27, %s958_s16 }
  0x88   : > { %p962_p9 = pneg %p961_p7  ;;  %p968_p13 = por %p967_p4, %p966_p0 }
  0x8a   : > { %p969_p2 = pnand %p968_p13, %p962_p9 }
  0x8c   : > { %972 = shalt.err (!%p969_p2)
}
  0x8d   : > { %s1072_s10 = smov 256   ;;  %s1073_s18 = smov 16  }
  0x8e   : > { %754 = dma.hbm_to_vmem [thread:$0]  (!%p1311_p11), %s1307_s6, 512, %s1315_s9, %s1317_s12, %s1072_s10, %s1072_s10, %s1073_s18  }
  0x8f   : > { %p1455_p12 = scmp.ne.s32.totalorder %s1449_s30, 0 }
  0x90   : > { %s1348_s8 = sand.u32 (!%p1455_p12), 1, %s1047_s19   ;;  %p1456_p1 = scmp.ne.s32.totalorder (!%p1455_p12), %s1446_s28, 0 }
  0x91   : > { %271 = sbr.rel (%p1455_p12) target bundleno = 628 (0x274), region = 40  ;;  %s690_s15 = sshll.u32 (!%p1455_p12), %s1348_s8, 5 }
  0x92   : > { %s274_s11 = scalar_lea.sflag (!%p1455_p12), [#allocation3], %s1348_s8  ;;  %s277_s13 = scalar_lea.vmem (!%p1455_p12), [#allocation2], %s690_s15 }
  0x98   : > { %1026 = dma.done.wait (%p1456_p1), %s274_s11, 512  }
  0x99   : > { %1028 = vsyncadd (%p1456_p1), %s274_s11, 4294966784  ;;  %p1457_p11 = scmp.ne.s32.totalorder %s1444_s26, 0 }
  0x9b   : > { %1030 = dma.done.wait (%p1457_p11), [#allocation6], 512  }
  0x9c   : > { %1032 = vsyncadd (%p1457_p11), [#allocation6], 4294966784 }
  0x9d   : > { %1034 = dma.done.wait (%p1457_p11), [#allocation9], 512  }
  0x9e   : > { %1036 = vsyncadd (%p1457_p11), [#allocation9], 4294966784  ;;  %v1074_v0 = vmov 0.0   ;;  %v1075_v1 = vmov 0   ;;  %v333_v2 = vld [vmem:[%s277_s13 + $0x8] sm:$0xff]  ;;  %v1366_v3 = vld [vmem:[%s277_s13 + $0x18] sm:$0xff] }
  0x9f   : > { %417 = vmatprep.mubr.f32.mxu0 %v1074_v0  ;;  %829 = vset.pattern.permute.xlu0 %v1075_v1  ;;  %v332_v4 = vld [vmem:[%s277_s13] sm:$0xff]  ;;  %v710_v5 = vpack.c.bf16 %v1366_v3, %v333_v2  ;;  %v334_v6 = vld [vmem:[%s277_s13 + $0x10] sm:$0xff]  ;;  %vm346_vm0 = vcmask 130048   ;;  %v327_v10 = vld [vmem:[#allocation7 + $0x8] sm:$0xff]  ;;  %s319_s26 = scalar_lea.vmem [#allocation11], %s690_s15  ;;  %s709_s30 = sshll.u32 %s1055_s21, 9 }
  0xa0   : > { %514 = vmatprep.mubr.f32.mxu1 %v1074_v0  ;;  %830 = vset.pattern.permute.xlu1 %v1075_v1  ;;  %v712_v7 = vpack.c.bf16 %v334_v6, %v332_v4  ;;  %v326_v8 = vld [vmem:[#allocation7] sm:$0xff]  ;;  %v324_v9 = vld [vmem:[#allocation5] sm:$0xff]  ;;  %v325_v11 = vld [vmem:[#allocation5 + $0x8] sm:$0xff]  ;;  %s552_s28 = sshll.u32 %s319_s26, 4  ;;  %s1381_s7 = scalar_lea.hbm %s1436_s5, %s709_s30  ;;  %s1376_s28 = int_to_ptr.vmem [resolvable:$true] %s552_s28 }
  0xa1   : > { %711 = vmatprep.subr.bf16.mxu0 %v710_v5  ;;  %338 = vperm.xlu0 %829, %v326_v8   ;;  %v330_v12 = vld [vmem:[#allocation10] sm:$0xff]  ;;  %v331_v13 = vld [vmem:[#allocation10 + $0x8] sm:$0xff]  ;;  %v328_v30 = vld [vmem:[#allocation8] sm:$0xff]  ;;  %s536_s21 = scalar_lea.sflag [#allocation4], %s1348_s8  ;;  %s973_s12 = scalar_lea.vmem %s1376_s28, 512 }
  0xa2   : > { %713 = vmatpush1.bf16.msra.mxu0 %v712_v7  ;;  %436 = vperm.xlu1 %830, %v330_v12   ;;  %v329_v31 = vld [vmem:[#allocation8 + $0x8] sm:$0xff]  ;;  %p974_p8 = scmp.ne.s32.totalorder %s1376_s28, %s973_s12  ;;  %s1076_s16 = smov [#allocation11]  }
  0xa3   : > { %s977_s17 = sshll.u32 %s1076_s16, 4  ;;  %s978_s17 = int_to_ptr.vmem [resolvable:$false] %s977_s17 }
  0xa4   : > { %p975_p6 = pnand %p974_p8, %p1293_p5  ;;  %s979_s25 = scalar_lea.vmem %s978_s17, 1024 }
  0xa5   : > { %696 = vmatmul.mubr.msk.f32.vlgmr.msra.gmra.mrb[0].mxu0 %vm346_vm0, %v324_v9  ;;  %343 = vperm.xlu0 %829, %v327_v10   ;;  %p980_p3 = scmp.lt.s32.totalorder %s1376_s28, %s978_s17  ;;  %p981_p7 = scmp.lt.s32.totalorder %s979_s25, %s973_s12 }
  0xa6   : > { %423 = vmatprep.mubr.f32.mxu0 %v1074_v0  ;;  %441 = vperm.xlu1 %830, %v331_v13   ;;  %p976_p10 = pneg %p975_p6 }
  0xa7   : > { %p982_p9 = por %p981_p7, %p980_p3 }
  0xa9   : > { %697 = vmatmul.mubr.msk.f32.gmra.mrb[2].mxu0 %vm346_vm0, %v325_v11  ;;  %p983_p0 = pnand %p982_p9, %p976_p10 }
 0x120   : > { %v339_v14 = vpop.permute.xlu0 %338 }
 0x121   : > { %v437_v32 = vpop.permute.xlu1 %436 }
 0x124   : > { %v344_v18 = vpop.permute.xlu0 %343 }
 0x125   : > { %v442_v38 = vpop.permute.xlu1 %441 }
 0x178   : > { %v419_v15 = vpop.f32.mrb[0].mxu0 }
 0x179   : > { %v421_v16 = vpop.f32.mrb[1].mxu0  ;;  %v420_v17 = vadd.f32 %v419_v15, %v339_v14 }
 0x17a   : > { %v422_v19 = vadd.f32 %v421_v16, %v339_v14 }
 0x17b   : > { %v430_v24 = vmax.f32 %v420_v17, 0.0 }
 0x17c   : > { %v425_v20 = vpop.f32.mrb[2].mxu0  ;;  %v431_v26 = vmax.f32 %v422_v19, 0.0 }
 0x17d   : > { %v426_v21 = vadd.f32 %v425_v20, %v344_v18  ;;  %v427_v22 = vpop.f32.mrb[3].mxu0 }
 0x17e   : > { %v428_v23 = vadd.f32 %v427_v22, %v344_v18 }
 0x17f   : > { %v432_v25 = vmax.f32 %v426_v21, 0.0 }
 0x180   : > { %v433_v27 = vmax.f32 %v428_v23, 0.0 }
 0x181   : > { %v716_v28 = vpack.c.bf16 %v432_v25, %v430_v24 }
 0x182   : > { %v714_v29 = vpack.c.bf16 %v433_v27, %v431_v26 }
 0x184   : > { %715 = vmatprep.subr.bf16.mxu1 %v714_v29 }
 0x185   : > { %717 = vmatpush1.bf16.msra.mxu1 %v716_v28 }
 0x188   : > { %698 = vmatmul.mubr.msk.f32.vlgmr.msra.gmra.mrb[0].mxu1 %vm346_vm0, %v328_v30 }
 0x189   : > { %520 = vmatprep.mubr.f32.mxu1 %v1074_v0 }
 0x18c   : > { %699 = vmatmul.mubr.msk.f32.gmra.mrb[2].mxu1 %vm346_vm0, %v329_v31 }
 0x25b   : > { %v516_v33 = vpop.f32.mrb[0].mxu1 }
 0x25c   : > { %v517_v34 = vadd.f32 %v516_v33, %v437_v32  ;;  %v518_v35 = vpop.f32.mrb[1].mxu1 }
 0x25d   : > { %v519_v36 = vadd.f32 %v518_v35, %v437_v32 }
 0x25e   : > { %v527_v37 = vadd.f32 %v517_v34, %v332_v4 }
 0x25f   : > { %v528_v39 = vadd.f32 %v519_v36, %v333_v2  ;;  %v522_v40 = vpop.f32.mrb[2].mxu1 }
 0x260   : > { %531 = vst [vmem:[%s319_s26] sm:$0xff] %v527_v37  ;;  %v523_v41 = vadd.f32 %v522_v40, %v442_v38  ;;  %v524_v42 = vpop.f32.mrb[3].mxu1 }
 0x261   : > { %532 = vst [vmem:[%s319_s26 + $0x8] sm:$0xff] %v528_v39  ;;  %v525_v43 = vadd.f32 %v524_v42, %v442_v38 }
 0x262   : > { %v529_v44 = vadd.f32 %v523_v41, %v334_v6 }
 0x263   : > { %v530_v45 = vadd.f32 %v525_v43, %v1366_v3 }
 0x264   : > { %533 = vst [vmem:[%s319_s26 + $0x10] sm:$0xff] %v529_v44 }
 0x265   : > { %534 = vst [vmem:[%s319_s26 + $0x18] sm:$0xff] %v530_v45 }
 0x266   : > { %986 = shalt.err (!%p983_p0)
}
 0x267   : > { %s987_s27 = scalar_lea.hbm %s1381_s7, 512  ;;  %s991_s15 = scalar_lea.hbm %s1436_s5, 1024 }
 0x268   : > { %p988_p4 = scmp.ne.s32.totalorder %s1381_s7, %s987_s27  ;;  %p992_p12 = scmp.lt.u32.totalorder %s1381_s7, %s1436_s5 }
 0x269   : > { %p993_p1 = scmp.lt.u32.totalorder %s991_s15, %s987_s27  ;;  %p995_p8 = scmp.lt.u32.totalorder %s987_s27, %s1381_s7 }
 0x26a   : > { %p989_p13 = pnand %p988_p4, %p1293_p5 }
 0x26b   : > { %p994_p11 = por %p993_p1, %p992_p12 }
 0x26c   : > { %p990_p2 = pneg %p989_p13 }
 0x26d   : > { %p996_p6 = por %p995_p8, %p994_p11 }
 0x26f   : > { %p997_p10 = pnand %p996_p6, %p990_p2 }
 0x271   : > { %1000 = shalt.err (!%p997_p10)
}
 0x272   : > { %s1077_s26 = smov 256   ;;  %s1078_s30 = smov 16  }
 0x273   : > { %736 = dma.vmem_to_hbm [thread:$0]  (%p1293_p5), %s1376_s28, 512, %s1381_s7, %s536_s21, %s1077_s26, %s1077_s26, %s1078_s30  }
 0x274 PF: > { %s1458_s6 = sld [smem:[#allocation16_spill]]  ;;  %s1459_s9 = sld [smem:[#allocation17_spill]] }
 0x275   : > { %p1461_p7 = scmp.ge.s32.totalorder %s1063_s23, 2 }
 0x27a   : > { %s567_s12 = sand.u32 1, %s1458_s6   ;;  %p1460_p3 = scmp.ne.s32.totalorder %s1459_s9, 0 }
 0x27b   : > { %s568_s16 = scalar_lea.sflag [#allocation4], %s567_s12 }
 0x27c   : > { %p756_p9 = pnand %p1461_p7, %p1460_p3 }
 0x27e   : > { %1038 = dma.done.wait (!%p756_p9), %s568_s16, 512  }
 0x27f   : > { %1040 = vsyncadd (!%p756_p9), %s568_s16, 4294966784  ;;  %s23_s23 = sadd.s32 1, %s1063_s23   ;;  %s1462_s18 = smov %s1047_s19 }
 0x280   : > { %p20_p0 = scmp.ge.s32.totalorder %s23_s23, 4   ;;  %s1463_s19 = smov %s1051_s20 }
 0x281   : > { %s1464_s20 = smov %s1302_s14  ;;  %s1465_s21 = smov %s1059_s22 }
 0x282   : > { %s1466_s22 = smov %s1468_s24  ;;  %22 = sbr.rel (!%p20_p0) target bundleno = 8 (0x8), region = 101 }
 0x289   :  { %573 = vsyncpa [#allocation3], 1 }
 0x28a   :  { %575 = vsyncpa [#allocation3 + $0x1], 1 }
 0x28b   :  { %576 = vsyncpa [#allocation6], 1 }
 0x28c   :  { %577 = vsyncpa [#allocation9], 1 }
 0x28d   :  { %578 = vsyncpa [#allocation4], 1 }
 0x28e   :  { %580 = vsyncpa [#allocation4 + $0x1], 1 }

</bundles_post_ra>
